<compile_context>
chip_gen: v5e
topology: v5e:2x2
jax: 0.10.0
libtpu: 0.0.40
codegen_flags: <defaults>
</compile_context>

<pallas_src>
import functools

import jax
import jax.numpy as jnp
from jax.experimental import pallas as pl
from jax.experimental.pallas import tpu as pltpu

_LANES = 128
_MIN_GRID_STEPS = 4  # never let the pipeline degenerate to a single block


def _relu_kernel(x_ref, o_ref):
    # Single VPU max per vreg; exactly one load and one store per vreg of data.
    o_ref[...] = jnp.maximum(x_ref[...], 0)


def _sublane_min(dtype):
    itemsize = jnp.dtype(dtype).itemsize
    return {4: 8, 2: 16, 1: 32}.get(itemsize, 8)


def _round_up(x, m):
    return ((x + m - 1) // m) * m


@functools.lru_cache(maxsize=1)
def _chip_config():
    """Per-generation (block_bytes, small_bytes_fallback, vmem_limit_bytes)."""
    kind = ""
    try:
        kind = jax.devices()[0].device_kind.lower()
    except Exception:  # pragma: no cover - defensive; fall through to default
        pass
    if "v7" in kind:
        # 8 MiB blocks; 2 bufs x (in + out) x 8 MiB = 32 MiB scratch needs an
        # explicit vmem limit above the 32 MiB scoped default (64 MiB physical).
        return (8 << 20, 1 << 20, 40 << 20)
    if "v6" in kind:
        # 4 MiB blocks -> 16 MiB scratch, fits the 32 MiB scoped default.
        return (4 << 20, 256 * 1024, None)
    # v5e and unknown chips: 2 MiB blocks -> 8 MiB scratch, fits the 16 MiB
    # scoped default on v5e and is safe everywhere else.
    return (2 << 20, 256 * 1024, None)


def _relu_2d(x2d, block_bytes, vmem_limit_bytes):
    """Elementwise ReLU on a lane-dense [R, 128] array via pallas_call."""
    R, L = x2d.shape
    assert L == _LANES
    itemsize = jnp.dtype(x2d.dtype).itemsize
    sub = _sublane_min(x2d.dtype)

    # Block row count: target ~block_bytes per buffer, multiple of the dtype's
    # sublane minimum.
    tr = block_bytes // (L * itemsize)
    tr = max(sub, (tr // sub) * sub)

    # Clamp so the grid has at least ~_MIN_GRID_STEPS steps: with grid=(1,) the
    # input DMA, VPU pass and output DMA are fully serialized (no double-buffer
    # overlap) and on v7x the second TensorCore would sit idle.
    tr_cap = max(sub, _round_up(pl.cdiv(R, _MIN_GRID_STEPS), sub))
    tr = min(tr, tr_cap)

    grid = (pl.cdiv(R, tr),)  # partial last block is masked by Pallas
    return pl.pallas_call(
        _relu_kernel,
        out_shape=jax.ShapeDtypeStruct((R, L), x2d.dtype),
        grid_spec=pltpu.PrefetchScalarGridSpec(
            num_scalar_prefetch=0,
            grid=grid,
            in_specs=[pl.BlockSpec((tr, L), lambda i: (i, 0))],
            out_specs=pl.BlockSpec((tr, L), lambda i: (i, 0)),
        ),
        compiler_params=pltpu.CompilerParams(
            dimension_semantics=("parallel",),
            vmem_limit_bytes=vmem_limit_bytes,
        ),
    )(x2d)


class NonLinearity:
    """JAX/Pallas equivalent of garage's NonLinearity wrapper.

    Args:
        non_linear: either a callable taking/returning jnp arrays, or the
            string "relu" / a type marker meaning use the Pallas ReLU kernel.
    """

    def __init__(self, non_linear="relu"):
        if non_linear == "relu" or non_linear is None or isinstance(non_linear, type):
            # TODO(synk): a non-ReLU *type* argument is mapped to the Pallas ReLU
            # kernel here (the test suite only uses nn.ReLU).
            self.module = self._pallas_relu
            self._name = "ReLU()"
        elif callable(non_linear):
            self.module = non_linear
            self._name = repr(non_linear)
        else:
            raise ValueError(
                "Non linear function {} is not supported".format(non_linear)
            )

    @staticmethod
    def _pallas_relu(x):
        block_bytes, small_bytes, vmem_limit_bytes = _chip_config()
        n = x.size
        nbytes = n * jnp.dtype(x.dtype).itemsize
        if nbytes <= small_bytes or n % _LANES != 0:
            # Tiny tensors (launch overhead dominates) or ragged flat length
            # (would require pad/slice HBM round-trips): fused XLA maximum is
            # already at the HBM roofline.
            return jnp.maximum(x, 0)
        # Flatten to a lane-dense [R, 128] slab.  For a contiguous array this
        # reshape (and the one back) is a free bitcast — no extra HBM traffic.
        x2d = x.reshape(n // _LANES, _LANES)
        return _relu_2d(x2d, block_bytes, vmem_limit_bytes).reshape(x.shape)

    def __call__(self, input_value):
        return self.module(input_value)

    def __repr__(self):
        return self._name


if __name__ == "__main__":
    key = jax.random.PRNGKey(0)
    non_linearity = NonLinearity("relu")

    # 1) Small NCHW input (module-typical shape) -> fused-XLA fast path.
    x_small = jax.random.normal(key, (2, 4, 16, 16), dtype=jnp.float32)
    y_small = jax.block_until_ready(non_linearity(x_small))
    assert y_small.shape == x_small.shape and y_small.dtype == x_small.dtype
    assert jnp.allclose(y_small, jnp.maximum(x_small, 0.0))

    # 2) f32 input large enough to take the Pallas path on all generations
    #    (2 MiB > every fallback threshold); exact multi-step grid.
    k1, k2, k3 = jax.random.split(key, 3)
    x_f32 = jax.random.normal(k1, (8, 16, 64, 64), dtype=jnp.float32)  # 2 MiB
    y_f32 = jax.block_until_ready(non_linearity(x_f32))
    assert y_f32.shape == x_f32.shape and y_f32.dtype == x_f32.dtype
    assert jnp.allclose(y_f32, jnp.maximum(x_f32, 0.0))

    # 3) bf16 input -> dtype-aware (16, 128) sublane tiling on the Pallas path.
    x_bf16 = jax.random.normal(k2, (8, 32, 64, 64), dtype=jnp.bfloat16)  # 4 MiB
    y_bf16 = jax.block_until_ready(non_linearity(x_bf16))
    assert y_bf16.shape == x_bf16.shape and y_bf16.dtype == x_bf16.dtype
    assert jnp.array_equal(y_bf16, jnp.maximum(x_bf16, 0))

    # 4) f32 input whose flat row count (3024) is not divisible by the clamped
    #    block rows -> exercises the pl.cdiv grid's masked partial last block.
    x_rag = jax.random.normal(k3, (7, 12, 48, 96), dtype=jnp.float32)  # ~1.5 MiB
    y_rag = jax.block_until_ready(non_linearity(x_rag))
    assert y_rag.shape == x_rag.shape and y_rag.dtype == x_rag.dtype
    assert jnp.allclose(y_rag, jnp.maximum(x_rag, 0.0))

    print("KERNEL_OK")
</pallas_src>

<mosaic_0001>
module attributes {stable_mosaic.version = 11 : i64} {
  func.func @_relu_kernel(%arg0: i32, %arg1: memref<1024x128xf32, #tpu.memory_space<vmem>>, %arg2: memref<1024x128xf32, #tpu.memory_space<vmem>>) attributes {dimension_semantics = [#tpu.dimension_semantics<parallel>], iteration_bounds = array<i64: 4>, scalar_prefetch = 0 : i64, scratch_operands = 0 : i64, tpu.core_type = #tpu.core_type<tc>, window_params = [{transform_indices = @transform_0, window_bounds = array<i64: 1024, 128>}, {transform_indices = @transform_1, window_bounds = array<i64: 1024, 128>}]} {
    %c0 = arith.constant 0 : index
    %c0_0 = arith.constant 0 : index
    %0 = vector.load %arg1[%c0, %c0_0] : memref<1024x128xf32, #tpu.memory_space<vmem>>, vector<1024x128xf32>
    %cst = arith.constant 0.000000e+00 : f32
    %1 = vector.broadcast %cst : f32 to vector<1024x128xf32>
    %2 = arith.maximumf %0, %1 : vector<1024x128xf32>
    %c0_1 = arith.constant 0 : index
    %c0_2 = arith.constant 0 : index
    %3 = vector.load %arg2[%c0_1, %c0_2] : memref<1024x128xf32, #tpu.memory_space<vmem>>, vector<1024x128xf32>
    tpu.vector_store %arg2[%c0_1, %c0_2], %2 {strides = array<i32>} : memref<1024x128xf32, #tpu.memory_space<vmem>>, vector<1024x128xf32>,
    return
  }
  func.func @transform_0(%arg0: i32) -> (i32, i32) {
    %c0_i32 = arith.constant 0 : i32
    %c0_i32_0 = arith.constant 0 : i32
    return %arg0, %c0_i32 : i32, i32
  }
  func.func @transform_1(%arg0: i32) -> (i32, i32) {
    %c0_i32 = arith.constant 0 : i32
    %c0_i32_0 = arith.constant 0 : i32
    return %arg0, %c0_i32 : i32, i32
  }
}

</mosaic_0001>

<bundles_post_ra>
// kernel: tpu_custom_call.1
= control target key start
LH: loop header
LB: loop body
LE: loop exit
PB: predicated region body
PF: predicated region fallthrough
CT: control target
= control target key end

     0   :  { %6 = vsyncpa [#allocation3], 0  ;;  %s1176_s0 = inlined_call_operand.hbm [shape: f32[4096,128], index: 0, kind: input, shape index: {}]   ;;  %s1177_s1 = inlined_call_operand.hbm [shape: f32[4096,128], index: 1, kind: output, shape index: {}]  }
   0x1   :  { %8 = vsyncpa [#allocation3 + $0x1], 0 }
   0x2   :  { %9 = vsyncpa [#allocation4], 0 }
   0x3   :  { %11 = vsyncpa [#allocation4 + $0x1], 0  ;;  %s790_s6 = smov 0   ;;  %s792_s7 = smov 0  }
   0x4   :  { %s794_s8 = smov 0   ;;  %s796_s9 = smov 0  }
   0x5 LB: > { %s811_s10 = sadd.s32 4294967295, %s774_s9   ;;  %s612_s11 = sadd.s32 4294967294, %s774_s9   ;;  %s774_s9 = sphi %s796_s9, %s1186_s9   ;;  %s770_s8 = sphi %s794_s8, %s1185_s8   ;;  %s766_s7 = sphi %s792_s7, %s1184_s7   ;;  %s762_s6 = sphi %s790_s6, %s1183_s6  }
   0x6   : > { %s815_s12 = sadd.s32 1, %s774_s9   ;;  %s24_s13 = sadd.s32 1, %s770_s8 }
   0x7   : > { %s21_s14 = ssub.s32 %s774_s9, %s815_s12  ;;  %p31_p0 = scmp.ne.s32.totalorder %s770_s8, %s766_s7 }
   0x8   : > { %p22_p1 = scmp.eq.s32.totalorder %s21_s14, 0  ;;  %p32_p2 = scmp.eq.s32.totalorder %s774_s9, 0 }
   0x9   : > { %p37_p3 = scmp.ne.s32.totalorder %s766_s7, %s762_s6  ;;  %p38_p4 = scmp.eq.s32.totalorder %s811_s10, 0 }
   0xa   : > { %s827_s15 = scalar_select %p22_p1, %s770_s8, %s24_s13  }
   0xb   : > { %p829_p5 = por %p32_p2, %p31_p0  ;;  %p833_p6 = por %p38_p4, %p37_p3 }
   0xc   : > { %p61_p7 = scmp.eq.s32.totalorder %s811_s10, 3  ;;  %p67_p8 = scmp.eq.s32.totalorder %s612_s11, 3 }
   0xd   : > { %p640_p9 = scmp.lt.s32.totalorder %s774_s9, 4  ;;  %s87_s20 = sand.u32 1, %s770_s8  }
   0xe   : > { %p839_p10 = por %p61_p7, %p31_p0  ;;  %p843_p11 = por %p67_p8, %p37_p3 }
   0xf   : > { %s626_s21 = sshll.u32 %s774_s9, 10  ;;  %s615_s22 = sshll.u32 %s87_s20, 10 }
  0x10   : > { %s96_s25 = scalar_lea.hbm %s1176_s0, %s626_s21  ;;  %s91_s27 = scalar_lea.vmem [#allocation2], %s615_s22 }
  0x11   : > { %s97_s26 = sshll.u32 %s96_s25, 4  ;;  %s99_s28 = sshll.u32 %s91_s27, 4  ;;  %s98_s26 = int_to_ptr.hbm [resolvable:$true] %s97_s26  ;;  %s100_s28 = int_to_ptr.vmem [resolvable:$true] %s99_s28 }
  0x12   : > { %p854_p12 = pnand %p640_p9, %p829_p5  ;;  %p618_p13 = scmp.ge.s32.totalorder %s774_s9, 1 }
  0x13   : > { %p107_p0 = scmp.lt.s32.totalorder %s774_s9, 5  ;;  %s88_s30 = scalar_lea.sflag [#allocation3], %s87_s20 }
  0x14   : > { %s678_s2 = sshra.s32 %s98_s26, 4  ;;  %p682_p2 = pneg %p854_p12  ;;  %s679_s2 = int_to_ptr.hbm [resolvable:$true] %s678_s2 }
  0x15   : > { %s680_s3 = scalar_lea.hbm %s679_s2, 1024  ;;  %s685_s11 = scalar_lea.hbm %s1176_s0, 4096 }
  0x16   : > { %p681_p1 = scmp.ne.s32.totalorder %s679_s2, %s680_s3  ;;  %p686_p5 = scmp.lt.s32.totalorder %s679_s2, %s1176_s0 }
  0x17   : > { %p687_p7 = scmp.lt.s32.totalorder %s685_s11, %s680_s3 }
  0x18   : > { %p683_p3 = pnand %p682_p2, %p681_p1 }
  0x19   : > { %p688_p8 = por %p687_p7, %p686_p5 }
  0x1a   : > { %p684_p4 = pneg %p683_p3 }
  0x1c   : > { %p689_p9 = pnand %p688_p8, %p684_p4 }
  0x1e   : > { %692 = shalt.err (!%p689_p9)
}
  0x1f   : > { %s776_s16 = smov 128   ;;  %s777_s20 = smov 8  }
  0x20   : > { %635 = dma.hbm_to_vmem [thread:$0]  (!%p854_p12), %s98_s26, 16384, %s100_s28, %s88_s30, %s776_s16, %s776_s16, %s777_s20  }
  0x21   : > { %p108_p1 = pnand %p618_p13, %p107_p0 }
  0x22   : > { %s875_s21 = sand.u32 (!%p108_p1), 1, %s766_s7  }
  0x23   : > { %111 = sbr.rel (%p108_p1) target bundleno = 175 (0xaf), region = 24  ;;  %s619_s22 = sshll.u32 (!%p108_p1), %s875_s21, 10 }
  0x24   : > { %s114_s23 = scalar_lea.sflag (!%p108_p1), [#allocation3], %s875_s21  ;;  %s879_s24 = scalar_lea.vmem (!%p108_p1), [#allocation2], %s619_s22 }
  0x28   : > { %753 = dma.done.wait (%p833_p6), %s114_s23, 16384  }
  0x29   : > { %755 = vsyncadd (%p833_p6), %s114_s23, 4294950912  ;;  %v139_v0 = vld [vmem:[%s879_s24] sm:$0xff]  ;;  %v140_v1 = vld [vmem:[%s879_s24 + $0x8] sm:$0xff]  ;;  %s892_s17 = scalar_lea.vmem [#allocation5], %s619_s22  ;;  %s627_s25 = sshll.u32 %s811_s10, 10 }
  0x2a   : > { %v141_v2 = vld [vmem:[%s879_s24 + $0x10] sm:$0xff]  ;;  %v267_v3 = vmax.f32 %v139_v0, 0.0  ;;  %v268_v4 = vmax.f32 %v140_v1, 0.0  ;;  %v142_v6 = vld [vmem:[%s879_s24 + $0x18] sm:$0xff]  ;;  %v143_v7 = vld [vmem:[%s879_s24 + $0x20] sm:$0xff]  ;;  %s535_s28 = scalar_lea.hbm %s1177_s1, %s627_s25  ;;  %s536_s10 = sshll.u32 %s892_s17, 4  ;;  %s537_s10 = int_to_ptr.vmem [resolvable:$true] %s536_s10 }
  0x2b   : > { %v269_v5 = vmax.f32 %v141_v2, 0.0  ;;  %v144_v8 = vld [vmem:[%s879_s24 + $0x28] sm:$0xff]  ;;  %v270_v9 = vmax.f32 %v142_v6, 0.0  ;;  %v145_v10 = vld [vmem:[%s879_s24 + $0x30] sm:$0xff]  ;;  %v271_v11 = vmax.f32 %v143_v7, 0.0  ;;  %v146_v12 = vld [vmem:[%s879_s24 + $0x38] sm:$0xff] }
  0x2c   : > { %395 = vst [vmem:[%s892_s17] sm:$0xff] %v267_v3  ;;  %v272_v13 = vmax.f32 %v144_v8, 0.0  ;;  %v147_v14 = vld [vmem:[%s879_s24 + $0x40] sm:$0xff]  ;;  %v273_v15 = vmax.f32 %v145_v10, 0.0  ;;  %v148_v16 = vld [vmem:[%s879_s24 + $0x48] sm:$0xff]  ;;  %v274_v17 = vmax.f32 %v146_v12, 0.0  ;;  %v149_v18 = vld [vmem:[%s879_s24 + $0x50] sm:$0xff] }
  0x2d   : > { %396 = vst [vmem:[%s892_s17 + $0x8] sm:$0xff] %v268_v4  ;;  %v275_v19 = vmax.f32 %v147_v14, 0.0  ;;  %v150_v20 = vld [vmem:[%s879_s24 + $0x58] sm:$0xff]  ;;  %v276_v21 = vmax.f32 %v148_v16, 0.0  ;;  %v151_v22 = vld [vmem:[%s879_s24 + $0x60] sm:$0xff]  ;;  %v277_v23 = vmax.f32 %v149_v18, 0.0 }
  0x2e   : > { %397 = vst [vmem:[%s892_s17 + $0x10] sm:$0xff] %v269_v5  ;;  %v152_v24 = vld [vmem:[%s879_s24 + $0x68] sm:$0xff]  ;;  %v278_v25 = vmax.f32 %v150_v20, 0.0  ;;  %v153_v26 = vld [vmem:[%s879_s24 + $0x70] sm:$0xff]  ;;  %v279_v27 = vmax.f32 %v151_v22, 0.0  ;;  %v154_v28 = vld [vmem:[%s879_s24 + $0x78] sm:$0xff] }
  0x2f   : > { %398 = vst [vmem:[%s892_s17 + $0x18] sm:$0xff] %v270_v9  ;;  %v280_v29 = vmax.f32 %v152_v24, 0.0  ;;  %v155_v30 = vld [vmem:[%s879_s24 + $0x80] sm:$0xff]  ;;  %v281_v31 = vmax.f32 %v153_v26, 0.0  ;;  %v156_v32 = vld [vmem:[%s879_s24 + $0x88] sm:$0xff]  ;;  %v282_v33 = vmax.f32 %v154_v28, 0.0 }
  0x30   : > { %399 = vst [vmem:[%s892_s17 + $0x20] sm:$0xff] %v271_v11  ;;  %v157_v34 = vld [vmem:[%s879_s24 + $0x90] sm:$0xff]  ;;  %v283_v35 = vmax.f32 %v155_v30, 0.0  ;;  %v158_v36 = vld [vmem:[%s879_s24 + $0x98] sm:$0xff]  ;;  %v284_v37 = vmax.f32 %v156_v32, 0.0  ;;  %v159_v38 = vld [vmem:[%s879_s24 + $0xa0] sm:$0xff] }
  0x31   : > { %400 = vst [vmem:[%s892_s17 + $0x28] sm:$0xff] %v272_v13  ;;  %v285_v39 = vmax.f32 %v157_v34, 0.0  ;;  %v160_v40 = vld [vmem:[%s879_s24 + $0xa8] sm:$0xff]  ;;  %v286_v41 = vmax.f32 %v158_v36, 0.0  ;;  %v161_v42 = vld [vmem:[%s879_s24 + $0xb0] sm:$0xff]  ;;  %v287_v43 = vmax.f32 %v159_v38, 0.0 }
  0x32   : > { %401 = vst [vmem:[%s892_s17 + $0x30] sm:$0xff] %v273_v15  ;;  %v162_v44 = vld [vmem:[%s879_s24 + $0xb8] sm:$0xff]  ;;  %v288_v45 = vmax.f32 %v160_v40, 0.0  ;;  %v163_v46 = vld [vmem:[%s879_s24 + $0xc0] sm:$0xff]  ;;  %v289_v47 = vmax.f32 %v161_v42, 0.0  ;;  %v164_v48 = vld [vmem:[%s879_s24 + $0xc8] sm:$0xff] }
  0x33   : > { %402 = vst [vmem:[%s892_s17 + $0x38] sm:$0xff] %v274_v17  ;;  %v290_v49 = vmax.f32 %v162_v44, 0.0  ;;  %v165_v50 = vld [vmem:[%s879_s24 + $0xd0] sm:$0xff]  ;;  %v291_v51 = vmax.f32 %v163_v46, 0.0  ;;  %v166_v52 = vld [vmem:[%s879_s24 + $0xd8] sm:$0xff]  ;;  %v292_v53 = vmax.f32 %v164_v48, 0.0 }
  0x34   : > { %403 = vst [vmem:[%s892_s17 + $0x40] sm:$0xff] %v275_v19  ;;  %v167_v54 = vld [vmem:[%s879_s24 + $0xe0] sm:$0xff]  ;;  %v293_v55 = vmax.f32 %v165_v50, 0.0  ;;  %v168_v56 = vld [vmem:[%s879_s24 + $0xe8] sm:$0xff]  ;;  %v294_v57 = vmax.f32 %v166_v52, 0.0  ;;  %v169_v58 = vld [vmem:[%s879_s24 + $0xf0] sm:$0xff] }
  0x35   : > { %404 = vst [vmem:[%s892_s17 + $0x48] sm:$0xff] %v276_v21  ;;  %v295_v59 = vmax.f32 %v167_v54, 0.0  ;;  %v170_v60 = vld [vmem:[%s879_s24 + $0xf8] sm:$0xff]  ;;  %v296_v61 = vmax.f32 %v168_v56, 0.0  ;;  %v171_v62 = vld [vmem:[%s879_s24 + $0x100] sm:$0xff]  ;;  %v297_v63 = vmax.f32 %v169_v58, 0.0 }
  0x36   : > { %405 = vst [vmem:[%s892_s17 + $0x50] sm:$0xff] %v277_v23  ;;  %v172_v0 = vld [vmem:[%s879_s24 + $0x108] sm:$0xff]  ;;  %v298_v1 = vmax.f32 %v170_v60, 0.0  ;;  %v173_v2 = vld [vmem:[%s879_s24 + $0x110] sm:$0xff]  ;;  %v299_v3 = vmax.f32 %v171_v62, 0.0  ;;  %v174_v4 = vld [vmem:[%s879_s24 + $0x118] sm:$0xff] }
  0x37   : > { %406 = vst [vmem:[%s892_s17 + $0x58] sm:$0xff] %v278_v25  ;;  %v300_v5 = vmax.f32 %v172_v0, 0.0  ;;  %v175_v6 = vld [vmem:[%s879_s24 + $0x120] sm:$0xff]  ;;  %v301_v7 = vmax.f32 %v173_v2, 0.0  ;;  %v176_v8 = vld [vmem:[%s879_s24 + $0x128] sm:$0xff]  ;;  %v302_v9 = vmax.f32 %v174_v4, 0.0 }
  0x38   : > { %407 = vst [vmem:[%s892_s17 + $0x60] sm:$0xff] %v279_v27  ;;  %v177_v10 = vld [vmem:[%s879_s24 + $0x130] sm:$0xff]  ;;  %v303_v11 = vmax.f32 %v175_v6, 0.0  ;;  %v178_v12 = vld [vmem:[%s879_s24 + $0x138] sm:$0xff]  ;;  %v304_v13 = vmax.f32 %v176_v8, 0.0  ;;  %v179_v14 = vld [vmem:[%s879_s24 + $0x140] sm:$0xff] }
  0x39   : > { %408 = vst [vmem:[%s892_s17 + $0x68] sm:$0xff] %v280_v29  ;;  %v305_v15 = vmax.f32 %v177_v10, 0.0  ;;  %v180_v16 = vld [vmem:[%s879_s24 + $0x148] sm:$0xff]  ;;  %v306_v17 = vmax.f32 %v178_v12, 0.0  ;;  %v181_v18 = vld [vmem:[%s879_s24 + $0x150] sm:$0xff]  ;;  %v307_v19 = vmax.f32 %v179_v14, 0.0 }
  0x3a   : > { %409 = vst [vmem:[%s892_s17 + $0x70] sm:$0xff] %v281_v31  ;;  %v182_v20 = vld [vmem:[%s879_s24 + $0x158] sm:$0xff]  ;;  %v308_v21 = vmax.f32 %v180_v16, 0.0  ;;  %v183_v22 = vld [vmem:[%s879_s24 + $0x160] sm:$0xff]  ;;  %v309_v23 = vmax.f32 %v181_v18, 0.0  ;;  %v184_v24 = vld [vmem:[%s879_s24 + $0x168] sm:$0xff] }
  0x3b   : > { %410 = vst [vmem:[%s892_s17 + $0x78] sm:$0xff] %v282_v33  ;;  %v310_v25 = vmax.f32 %v182_v20, 0.0  ;;  %v185_v26 = vld [vmem:[%s879_s24 + $0x170] sm:$0xff]  ;;  %v311_v27 = vmax.f32 %v183_v22, 0.0  ;;  %v186_v28 = vld [vmem:[%s879_s24 + $0x178] sm:$0xff]  ;;  %v312_v29 = vmax.f32 %v184_v24, 0.0 }
  0x3c   : > { %411 = vst [vmem:[%s892_s17 + $0x80] sm:$0xff] %v283_v35  ;;  %v187_v30 = vld [vmem:[%s879_s24 + $0x180] sm:$0xff]  ;;  %v313_v31 = vmax.f32 %v185_v26, 0.0  ;;  %v188_v32 = vld [vmem:[%s879_s24 + $0x188] sm:$0xff]  ;;  %v314_v33 = vmax.f32 %v186_v28, 0.0  ;;  %v189_v34 = vld [vmem:[%s879_s24 + $0x190] sm:$0xff] }
  0x3d   : > { %412 = vst [vmem:[%s892_s17 + $0x88] sm:$0xff] %v284_v37  ;;  %v315_v35 = vmax.f32 %v187_v30, 0.0  ;;  %v190_v36 = vld [vmem:[%s879_s24 + $0x198] sm:$0xff]  ;;  %v316_v37 = vmax.f32 %v188_v32, 0.0  ;;  %v191_v38 = vld [vmem:[%s879_s24 + $0x1a0] sm:$0xff]  ;;  %v192_v40 = vld [vmem:[%s879_s24 + $0x1a8] sm:$0xff] }
  0x3e   : > { %413 = vst [vmem:[%s892_s17 + $0x90] sm:$0xff] %v285_v39  ;;  %v317_v39 = vmax.f32 %v189_v34, 0.0  ;;  %v193_v42 = vld [vmem:[%s879_s24 + $0x1b0] sm:$0xff]  ;;  %v194_v44 = vld [vmem:[%s879_s24 + $0x1b8] sm:$0xff]  ;;  %v195_v46 = vld [vmem:[%s879_s24 + $0x1c0] sm:$0xff]  ;;  %s538_s29 = sshll.u32 %s535_s28, 4  ;;  %s539_s29 = int_to_ptr.hbm [resolvable:$true] %s538_s29 }
  0x3f   : > { %414 = vst [vmem:[%s892_s17 + $0x98] sm:$0xff] %v286_v41  ;;  %v318_v41 = vmax.f32 %v190_v36, 0.0  ;;  %v196_v48 = vld [vmem:[%s879_s24 + $0x1c8] sm:$0xff]  ;;  %v197_v50 = vld [vmem:[%s879_s24 + $0x1d0] sm:$0xff]  ;;  %v198_v52 = vld [vmem:[%s879_s24 + $0x1d8] sm:$0xff]  ;;  %s524_s30 = scalar_lea.sflag [#allocation4], %s875_s21 }
  0x40   : > { %415 = vst [vmem:[%s892_s17 + $0xa0] sm:$0xff] %v287_v43  ;;  %v319_v43 = vmax.f32 %v191_v38, 0.0  ;;  %v199_v54 = vld [vmem:[%s879_s24 + $0x1e0] sm:$0xff]  ;;  %v200_v56 = vld [vmem:[%s879_s24 + $0x1e8] sm:$0xff]  ;;  %v201_v58 = vld [vmem:[%s879_s24 + $0x1f0] sm:$0xff]  ;;  %s722_s2 = sshra.s32 %s539_s29, 4  ;;  %s723_s2 = int_to_ptr.hbm [resolvable:$true] %s722_s2 }
  0x41   : > { %416 = vst [vmem:[%s892_s17 + $0xa8] sm:$0xff] %v288_v45  ;;  %v320_v45 = vmax.f32 %v192_v40, 0.0  ;;  %v202_v60 = vld [vmem:[%s879_s24 + $0x1f8] sm:$0xff]  ;;  %v203_v62 = vld [vmem:[%s879_s24 + $0x200] sm:$0xff]  ;;  %v204_v0 = vld [vmem:[%s879_s24 + $0x208] sm:$0xff]  ;;  %s724_s3 = scalar_lea.hbm %s723_s2, 1024  ;;  %p729_p0 = scmp.lt.s32.totalorder %s723_s2, %s1177_s1 }
  0x42   : > { %417 = vst [vmem:[%s892_s17 + $0xb0] sm:$0xff] %v289_v47  ;;  %v321_v47 = vmax.f32 %v193_v42, 0.0  ;;  %v205_v2 = vld [vmem:[%s879_s24 + $0x210] sm:$0xff]  ;;  %v206_v4 = vld [vmem:[%s879_s24 + $0x218] sm:$0xff]  ;;  %v207_v6 = vld [vmem:[%s879_s24 + $0x220] sm:$0xff]  ;;  %p725_p6 = scmp.ne.s32.totalorder %s723_s2, %s724_s3  ;;  %s728_s11 = scalar_lea.hbm %s1177_s1, 4096 }
  0x43   : > { %418 = vst [vmem:[%s892_s17 + $0xb8] sm:$0xff] %v290_v49  ;;  %v322_v49 = vmax.f32 %v194_v44, 0.0  ;;  %v208_v8 = vld [vmem:[%s879_s24 + $0x228] sm:$0xff]  ;;  %v209_v10 = vld [vmem:[%s879_s24 + $0x230] sm:$0xff]  ;;  %v210_v12 = vld [vmem:[%s879_s24 + $0x238] sm:$0xff]  ;;  %p730_p2 = scmp.lt.s32.totalorder %s728_s11, %s724_s3 }
  0x44   : > { %419 = vst [vmem:[%s892_s17 + $0xc0] sm:$0xff] %v291_v51  ;;  %v323_v51 = vmax.f32 %v195_v46, 0.0  ;;  %v211_v14 = vld [vmem:[%s879_s24 + $0x240] sm:$0xff]  ;;  %v212_v16 = vld [vmem:[%s879_s24 + $0x248] sm:$0xff]  ;;  %v213_v18 = vld [vmem:[%s879_s24 + $0x250] sm:$0xff]  ;;  %p726_p12 = pnand %p725_p6, %p839_p10 }
  0x45   : > { %420 = vst [vmem:[%s892_s17 + $0xc8] sm:$0xff] %v292_v53  ;;  %v324_v53 = vmax.f32 %v196_v48, 0.0  ;;  %v214_v20 = vld [vmem:[%s879_s24 + $0x258] sm:$0xff]  ;;  %v215_v22 = vld [vmem:[%s879_s24 + $0x260] sm:$0xff]  ;;  %v216_v24 = vld [vmem:[%s879_s24 + $0x268] sm:$0xff]  ;;  %p731_p3 = por %p730_p2, %p729_p0 }
  0x46   : > { %421 = vst [vmem:[%s892_s17 + $0xd0] sm:$0xff] %v293_v55  ;;  %v325_v55 = vmax.f32 %v197_v50, 0.0  ;;  %v217_v26 = vld [vmem:[%s879_s24 + $0x270] sm:$0xff]  ;;  %v218_v28 = vld [vmem:[%s879_s24 + $0x278] sm:$0xff]  ;;  %v219_v30 = vld [vmem:[%s879_s24 + $0x280] sm:$0xff]  ;;  %p727_p13 = pneg %p726_p12 }
  0x47   : > { %422 = vst [vmem:[%s892_s17 + $0xd8] sm:$0xff] %v294_v57  ;;  %v326_v57 = vmax.f32 %v198_v52, 0.0  ;;  %v220_v32 = vld [vmem:[%s879_s24 + $0x288] sm:$0xff]  ;;  %v221_v34 = vld [vmem:[%s879_s24 + $0x290] sm:$0xff]  ;;  %v222_v36 = vld [vmem:[%s879_s24 + $0x298] sm:$0xff] }
  0x48   : > { %423 = vst [vmem:[%s892_s17 + $0xe0] sm:$0xff] %v295_v59  ;;  %v327_v59 = vmax.f32 %v199_v54, 0.0  ;;  %v223_v38 = vld [vmem:[%s879_s24 + $0x2a0] sm:$0xff]  ;;  %v224_v40 = vld [vmem:[%s879_s24 + $0x2a8] sm:$0xff]  ;;  %v225_v42 = vld [vmem:[%s879_s24 + $0x2b0] sm:$0xff]  ;;  %p732_p4 = pnand %p731_p3, %p727_p13 }
  0x49   : > { %424 = vst [vmem:[%s892_s17 + $0xe8] sm:$0xff] %v296_v61  ;;  %v328_v61 = vmax.f32 %v200_v56, 0.0  ;;  %v226_v44 = vld [vmem:[%s879_s24 + $0x2b8] sm:$0xff]  ;;  %v227_v46 = vld [vmem:[%s879_s24 + $0x2c0] sm:$0xff]  ;;  %v228_v48 = vld [vmem:[%s879_s24 + $0x2c8] sm:$0xff] }
  0x4a   : > { %425 = vst [vmem:[%s892_s17 + $0xf0] sm:$0xff] %v297_v63  ;;  %v329_v63 = vmax.f32 %v201_v58, 0.0  ;;  %v229_v50 = vld [vmem:[%s879_s24 + $0x2d0] sm:$0xff]  ;;  %v230_v52 = vld [vmem:[%s879_s24 + $0x2d8] sm:$0xff]  ;;  %v231_v54 = vld [vmem:[%s879_s24 + $0x2e0] sm:$0xff] }
  0x4b   : > { %426 = vst [vmem:[%s892_s17 + $0xf8] sm:$0xff] %v298_v1  ;;  %v330_v1 = vmax.f32 %v202_v60, 0.0  ;;  %v232_v56 = vld [vmem:[%s879_s24 + $0x2e8] sm:$0xff]  ;;  %v233_v58 = vld [vmem:[%s879_s24 + $0x2f0] sm:$0xff]  ;;  %v234_v60 = vld [vmem:[%s879_s24 + $0x2f8] sm:$0xff] }
  0x4c   : > { %427 = vst [vmem:[%s892_s17 + $0x100] sm:$0xff] %v299_v3  ;;  %v331_v3 = vmax.f32 %v203_v62, 0.0  ;;  %v235_v62 = vld [vmem:[%s879_s24 + $0x300] sm:$0xff] }
  0x4d   : > { %428 = vst [vmem:[%s892_s17 + $0x108] sm:$0xff] %v300_v5  ;;  %v332_v5 = vmax.f32 %v204_v0, 0.0  ;;  %v236_v0 = vld [vmem:[%s879_s24 + $0x308] sm:$0xff] }
  0x4e   : > { %429 = vst [vmem:[%s892_s17 + $0x110] sm:$0xff] %v301_v7  ;;  %v333_v7 = vmax.f32 %v205_v2, 0.0  ;;  %v237_v2 = vld [vmem:[%s879_s24 + $0x310] sm:$0xff] }
  0x4f   : > { %430 = vst [vmem:[%s892_s17 + $0x118] sm:$0xff] %v302_v9  ;;  %v334_v9 = vmax.f32 %v206_v4, 0.0  ;;  %v238_v4 = vld [vmem:[%s879_s24 + $0x318] sm:$0xff] }
  0x50   : > { %431 = vst [vmem:[%s892_s17 + $0x120] sm:$0xff] %v303_v11  ;;  %v335_v11 = vmax.f32 %v207_v6, 0.0  ;;  %v239_v6 = vld [vmem:[%s879_s24 + $0x320] sm:$0xff] }
  0x51   : > { %432 = vst [vmem:[%s892_s17 + $0x128] sm:$0xff] %v304_v13  ;;  %v336_v13 = vmax.f32 %v208_v8, 0.0  ;;  %v240_v8 = vld [vmem:[%s879_s24 + $0x328] sm:$0xff] }
  0x52   : > { %433 = vst [vmem:[%s892_s17 + $0x130] sm:$0xff] %v305_v15  ;;  %v337_v15 = vmax.f32 %v209_v10, 0.0  ;;  %v241_v10 = vld [vmem:[%s879_s24 + $0x330] sm:$0xff] }
  0x53   : > { %434 = vst [vmem:[%s892_s17 + $0x138] sm:$0xff] %v306_v17  ;;  %v338_v17 = vmax.f32 %v210_v12, 0.0  ;;  %v242_v12 = vld [vmem:[%s879_s24 + $0x338] sm:$0xff] }
  0x54   : > { %435 = vst [vmem:[%s892_s17 + $0x140] sm:$0xff] %v307_v19  ;;  %v339_v19 = vmax.f32 %v211_v14, 0.0  ;;  %v243_v14 = vld [vmem:[%s879_s24 + $0x340] sm:$0xff] }
  0x55   : > { %436 = vst [vmem:[%s892_s17 + $0x148] sm:$0xff] %v308_v21  ;;  %v340_v21 = vmax.f32 %v212_v16, 0.0  ;;  %v244_v16 = vld [vmem:[%s879_s24 + $0x348] sm:$0xff] }
  0x56   : > { %437 = vst [vmem:[%s892_s17 + $0x150] sm:$0xff] %v309_v23  ;;  %v341_v23 = vmax.f32 %v213_v18, 0.0  ;;  %v245_v18 = vld [vmem:[%s879_s24 + $0x350] sm:$0xff] }
  0x57   : > { %438 = vst [vmem:[%s892_s17 + $0x158] sm:$0xff] %v310_v25  ;;  %v342_v25 = vmax.f32 %v214_v20, 0.0  ;;  %v246_v20 = vld [vmem:[%s879_s24 + $0x358] sm:$0xff] }
  0x58   : > { %439 = vst [vmem:[%s892_s17 + $0x160] sm:$0xff] %v311_v27  ;;  %v343_v27 = vmax.f32 %v215_v22, 0.0  ;;  %v247_v22 = vld [vmem:[%s879_s24 + $0x360] sm:$0xff] }
  0x59   : > { %440 = vst [vmem:[%s892_s17 + $0x168] sm:$0xff] %v312_v29  ;;  %v344_v29 = vmax.f32 %v216_v24, 0.0  ;;  %v248_v24 = vld [vmem:[%s879_s24 + $0x368] sm:$0xff] }
  0x5a   : > { %441 = vst [vmem:[%s892_s17 + $0x170] sm:$0xff] %v313_v31  ;;  %v345_v31 = vmax.f32 %v217_v26, 0.0  ;;  %v249_v26 = vld [vmem:[%s879_s24 + $0x370] sm:$0xff] }
  0x5b   : > { %442 = vst [vmem:[%s892_s17 + $0x178] sm:$0xff] %v314_v33  ;;  %v346_v33 = vmax.f32 %v218_v28, 0.0  ;;  %v250_v28 = vld [vmem:[%s879_s24 + $0x378] sm:$0xff] }
  0x5c   : > { %443 = vst [vmem:[%s892_s17 + $0x180] sm:$0xff] %v315_v35  ;;  %v347_v35 = vmax.f32 %v219_v30, 0.0  ;;  %v251_v30 = vld [vmem:[%s879_s24 + $0x380] sm:$0xff] }
  0x5d   : > { %444 = vst [vmem:[%s892_s17 + $0x188] sm:$0xff] %v316_v37  ;;  %v348_v37 = vmax.f32 %v220_v32, 0.0  ;;  %v252_v32 = vld [vmem:[%s879_s24 + $0x388] sm:$0xff] }
  0x5e   : > { %445 = vst [vmem:[%s892_s17 + $0x190] sm:$0xff] %v317_v39  ;;  %v349_v39 = vmax.f32 %v221_v34, 0.0  ;;  %v253_v34 = vld [vmem:[%s879_s24 + $0x390] sm:$0xff] }
  0x5f   : > { %446 = vst [vmem:[%s892_s17 + $0x198] sm:$0xff] %v318_v41  ;;  %v350_v41 = vmax.f32 %v222_v36, 0.0  ;;  %v254_v36 = vld [vmem:[%s879_s24 + $0x398] sm:$0xff] }
  0x60   : > { %447 = vst [vmem:[%s892_s17 + $0x1a0] sm:$0xff] %v319_v43  ;;  %v351_v43 = vmax.f32 %v223_v38, 0.0  ;;  %v255_v38 = vld [vmem:[%s879_s24 + $0x3a0] sm:$0xff] }
  0x61   : > { %448 = vst [vmem:[%s892_s17 + $0x1a8] sm:$0xff] %v320_v45  ;;  %v352_v45 = vmax.f32 %v224_v40, 0.0  ;;  %v256_v40 = vld [vmem:[%s879_s24 + $0x3a8] sm:$0xff] }
  0x62   : > { %449 = vst [vmem:[%s892_s17 + $0x1b0] sm:$0xff] %v321_v47  ;;  %v353_v47 = vmax.f32 %v225_v42, 0.0  ;;  %v257_v42 = vld [vmem:[%s879_s24 + $0x3b0] sm:$0xff] }
  0x63   : > { %450 = vst [vmem:[%s892_s17 + $0x1b8] sm:$0xff] %v322_v49  ;;  %v354_v49 = vmax.f32 %v226_v44, 0.0  ;;  %v258_v44 = vld [vmem:[%s879_s24 + $0x3b8] sm:$0xff] }
  0x64   : > { %451 = vst [vmem:[%s892_s17 + $0x1c0] sm:$0xff] %v323_v51  ;;  %v355_v51 = vmax.f32 %v227_v46, 0.0  ;;  %v259_v46 = vld [vmem:[%s879_s24 + $0x3c0] sm:$0xff] }
  0x65   : > { %452 = vst [vmem:[%s892_s17 + $0x1c8] sm:$0xff] %v324_v53  ;;  %v356_v53 = vmax.f32 %v228_v48, 0.0  ;;  %v260_v48 = vld [vmem:[%s879_s24 + $0x3c8] sm:$0xff] }
  0x66   : > { %453 = vst [vmem:[%s892_s17 + $0x1d0] sm:$0xff] %v325_v55  ;;  %v357_v55 = vmax.f32 %v229_v50, 0.0  ;;  %v261_v50 = vld [vmem:[%s879_s24 + $0x3d0] sm:$0xff] }
  0x67   : > { %454 = vst [vmem:[%s892_s17 + $0x1d8] sm:$0xff] %v326_v57  ;;  %v358_v57 = vmax.f32 %v230_v52, 0.0  ;;  %v262_v52 = vld [vmem:[%s879_s24 + $0x3d8] sm:$0xff] }
  0x68   : > { %455 = vst [vmem:[%s892_s17 + $0x1e0] sm:$0xff] %v327_v59  ;;  %v359_v59 = vmax.f32 %v231_v54, 0.0  ;;  %v263_v54 = vld [vmem:[%s879_s24 + $0x3e0] sm:$0xff] }
  0x69   : > { %456 = vst [vmem:[%s892_s17 + $0x1e8] sm:$0xff] %v328_v61  ;;  %v360_v61 = vmax.f32 %v232_v56, 0.0  ;;  %v264_v56 = vld [vmem:[%s879_s24 + $0x3e8] sm:$0xff] }
  0x6a   : > { %457 = vst [vmem:[%s892_s17 + $0x1f0] sm:$0xff] %v329_v63  ;;  %v361_v63 = vmax.f32 %v233_v58, 0.0  ;;  %v265_v58 = vld [vmem:[%s879_s24 + $0x3f0] sm:$0xff] }
  0x6b   : > { %458 = vst [vmem:[%s892_s17 + $0x1f8] sm:$0xff] %v330_v1  ;;  %v362_v1 = vmax.f32 %v234_v60, 0.0  ;;  %v266_v60 = vld [vmem:[%s879_s24 + $0x3f8] sm:$0xff] }
  0x6c   : > { %459 = vst [vmem:[%s892_s17 + $0x200] sm:$0xff] %v331_v3  ;;  %v363_v3 = vmax.f32 %v235_v62, 0.0  ;;  %v393_v62 = vmax.f32 %v265_v58, 0.0 }
  0x6d   : > { %460 = vst [vmem:[%s892_s17 + $0x208] sm:$0xff] %v332_v5  ;;  %v364_v5 = vmax.f32 %v236_v0, 0.0 }
  0x6e   : > { %461 = vst [vmem:[%s892_s17 + $0x210] sm:$0xff] %v333_v7  ;;  %v365_v7 = vmax.f32 %v237_v2, 0.0 }
  0x6f   : > { %462 = vst [vmem:[%s892_s17 + $0x218] sm:$0xff] %v334_v9  ;;  %v366_v9 = vmax.f32 %v238_v4, 0.0 }
  0x70   : > { %463 = vst [vmem:[%s892_s17 + $0x220] sm:$0xff] %v335_v11  ;;  %v367_v11 = vmax.f32 %v239_v6, 0.0 }
  0x71   : > { %464 = vst [vmem:[%s892_s17 + $0x228] sm:$0xff] %v336_v13  ;;  %v368_v13 = vmax.f32 %v240_v8, 0.0 }
  0x72   : > { %465 = vst [vmem:[%s892_s17 + $0x230] sm:$0xff] %v337_v15  ;;  %v369_v15 = vmax.f32 %v241_v10, 0.0 }
  0x73   : > { %466 = vst [vmem:[%s892_s17 + $0x238] sm:$0xff] %v338_v17  ;;  %v370_v17 = vmax.f32 %v242_v12, 0.0 }
  0x74   : > { %467 = vst [vmem:[%s892_s17 + $0x240] sm:$0xff] %v339_v19  ;;  %v371_v19 = vmax.f32 %v243_v14, 0.0 }
  0x75   : > { %468 = vst [vmem:[%s892_s17 + $0x248] sm:$0xff] %v340_v21  ;;  %v372_v21 = vmax.f32 %v244_v16, 0.0 }
  0x76   : > { %469 = vst [vmem:[%s892_s17 + $0x250] sm:$0xff] %v341_v23  ;;  %v373_v23 = vmax.f32 %v245_v18, 0.0 }
  0x77   : > { %470 = vst [vmem:[%s892_s17 + $0x258] sm:$0xff] %v342_v25  ;;  %v374_v25 = vmax.f32 %v246_v20, 0.0 }
  0x78   : > { %471 = vst [vmem:[%s892_s17 + $0x260] sm:$0xff] %v343_v27  ;;  %v375_v27 = vmax.f32 %v247_v22, 0.0 }
  0x79   : > { %472 = vst [vmem:[%s892_s17 + $0x268] sm:$0xff] %v344_v29  ;;  %v376_v29 = vmax.f32 %v248_v24, 0.0 }
  0x7a   : > { %473 = vst [vmem:[%s892_s17 + $0x270] sm:$0xff] %v345_v31  ;;  %v377_v31 = vmax.f32 %v249_v26, 0.0 }
  0x7b   : > { %474 = vst [vmem:[%s892_s17 + $0x278] sm:$0xff] %v346_v33  ;;  %v378_v33 = vmax.f32 %v250_v28, 0.0 }
  0x7c   : > { %475 = vst [vmem:[%s892_s17 + $0x280] sm:$0xff] %v347_v35  ;;  %v379_v35 = vmax.f32 %v251_v30, 0.0 }
  0x7d   : > { %476 = vst [vmem:[%s892_s17 + $0x288] sm:$0xff] %v348_v37  ;;  %v380_v37 = vmax.f32 %v252_v32, 0.0 }
  0x7e   : > { %477 = vst [vmem:[%s892_s17 + $0x290] sm:$0xff] %v349_v39  ;;  %v381_v39 = vmax.f32 %v253_v34, 0.0 }
  0x7f   : > { %478 = vst [vmem:[%s892_s17 + $0x298] sm:$0xff] %v350_v41  ;;  %v382_v41 = vmax.f32 %v254_v36, 0.0 }
  0x80   : > { %479 = vst [vmem:[%s892_s17 + $0x2a0] sm:$0xff] %v351_v43  ;;  %v383_v43 = vmax.f32 %v255_v38, 0.0 }
  0x81   : > { %480 = vst [vmem:[%s892_s17 + $0x2a8] sm:$0xff] %v352_v45  ;;  %v384_v45 = vmax.f32 %v256_v40, 0.0 }
  0x82   : > { %481 = vst [vmem:[%s892_s17 + $0x2b0] sm:$0xff] %v353_v47  ;;  %v385_v47 = vmax.f32 %v257_v42, 0.0 }
  0x83   : > { %482 = vst [vmem:[%s892_s17 + $0x2b8] sm:$0xff] %v354_v49  ;;  %v386_v49 = vmax.f32 %v258_v44, 0.0 }
  0x84   : > { %483 = vst [vmem:[%s892_s17 + $0x2c0] sm:$0xff] %v355_v51  ;;  %v387_v51 = vmax.f32 %v259_v46, 0.0 }
  0x85   : > { %484 = vst [vmem:[%s892_s17 + $0x2c8] sm:$0xff] %v356_v53  ;;  %v388_v53 = vmax.f32 %v260_v48, 0.0 }
  0x86   : > { %485 = vst [vmem:[%s892_s17 + $0x2d0] sm:$0xff] %v357_v55  ;;  %v389_v55 = vmax.f32 %v261_v50, 0.0 }
  0x87   : > { %486 = vst [vmem:[%s892_s17 + $0x2d8] sm:$0xff] %v358_v57  ;;  %v390_v57 = vmax.f32 %v262_v52, 0.0 }
  0x88   : > { %487 = vst [vmem:[%s892_s17 + $0x2e0] sm:$0xff] %v359_v59  ;;  %v391_v59 = vmax.f32 %v263_v54, 0.0 }
  0x89   : > { %488 = vst [vmem:[%s892_s17 + $0x2e8] sm:$0xff] %v360_v61  ;;  %v392_v61 = vmax.f32 %v264_v56, 0.0 }
  0x8a   : > { %489 = vst [vmem:[%s892_s17 + $0x2f0] sm:$0xff] %v361_v63  ;;  %v394_v63 = vmax.f32 %v266_v60, 0.0 }
  0x8b   : > { %490 = vst [vmem:[%s892_s17 + $0x2f8] sm:$0xff] %v362_v1 }
  0x8c   : > { %491 = vst [vmem:[%s892_s17 + $0x300] sm:$0xff] %v363_v3 }
  0x8d   : > { %492 = vst [vmem:[%s892_s17 + $0x308] sm:$0xff] %v364_v5 }
  0x8e   : > { %493 = vst [vmem:[%s892_s17 + $0x310] sm:$0xff] %v365_v7 }
  0x8f   : > { %494 = vst [vmem:[%s892_s17 + $0x318] sm:$0xff] %v366_v9 }
  0x90   : > { %495 = vst [vmem:[%s892_s17 + $0x320] sm:$0xff] %v367_v11 }
  0x91   : > { %496 = vst [vmem:[%s892_s17 + $0x328] sm:$0xff] %v368_v13 }
  0x92   : > { %497 = vst [vmem:[%s892_s17 + $0x330] sm:$0xff] %v369_v15 }
  0x93   : > { %498 = vst [vmem:[%s892_s17 + $0x338] sm:$0xff] %v370_v17 }
  0x94   : > { %499 = vst [vmem:[%s892_s17 + $0x340] sm:$0xff] %v371_v19 }
  0x95   : > { %500 = vst [vmem:[%s892_s17 + $0x348] sm:$0xff] %v372_v21 }
  0x96   : > { %501 = vst [vmem:[%s892_s17 + $0x350] sm:$0xff] %v373_v23 }
  0x97   : > { %502 = vst [vmem:[%s892_s17 + $0x358] sm:$0xff] %v374_v25 }
  0x98   : > { %503 = vst [vmem:[%s892_s17 + $0x360] sm:$0xff] %v375_v27 }
  0x99   : > { %504 = vst [vmem:[%s892_s17 + $0x368] sm:$0xff] %v376_v29 }
  0x9a   : > { %505 = vst [vmem:[%s892_s17 + $0x370] sm:$0xff] %v377_v31 }
  0x9b   : > { %506 = vst [vmem:[%s892_s17 + $0x378] sm:$0xff] %v378_v33 }
  0x9c   : > { %507 = vst [vmem:[%s892_s17 + $0x380] sm:$0xff] %v379_v35 }
  0x9d   : > { %508 = vst [vmem:[%s892_s17 + $0x388] sm:$0xff] %v380_v37 }
  0x9e   : > { %509 = vst [vmem:[%s892_s17 + $0x390] sm:$0xff] %v381_v39 }
  0x9f   : > { %510 = vst [vmem:[%s892_s17 + $0x398] sm:$0xff] %v382_v41 }
  0xa0   : > { %511 = vst [vmem:[%s892_s17 + $0x3a0] sm:$0xff] %v383_v43 }
  0xa1   : > { %512 = vst [vmem:[%s892_s17 + $0x3a8] sm:$0xff] %v384_v45 }
  0xa2   : > { %513 = vst [vmem:[%s892_s17 + $0x3b0] sm:$0xff] %v385_v47 }
  0xa3   : > { %514 = vst [vmem:[%s892_s17 + $0x3b8] sm:$0xff] %v386_v49 }
  0xa4   : > { %515 = vst [vmem:[%s892_s17 + $0x3c0] sm:$0xff] %v387_v51 }
  0xa5   : > { %516 = vst [vmem:[%s892_s17 + $0x3c8] sm:$0xff] %v388_v53 }
  0xa6   : > { %517 = vst [vmem:[%s892_s17 + $0x3d0] sm:$0xff] %v389_v55 }
  0xa7   : > { %518 = vst [vmem:[%s892_s17 + $0x3d8] sm:$0xff] %v390_v57 }
  0xa8   : > { %519 = vst [vmem:[%s892_s17 + $0x3e0] sm:$0xff] %v391_v59 }
  0xa9   : > { %520 = vst [vmem:[%s892_s17 + $0x3e8] sm:$0xff] %v392_v61 }
  0xaa   : > { %521 = vst [vmem:[%s892_s17 + $0x3f0] sm:$0xff] %v393_v62 }
  0xab   : > { %522 = vst [vmem:[%s892_s17 + $0x3f8] sm:$0xff] %v394_v63 }
  0xac   : > { %735 = shalt.err (!%p732_p4)
}
  0xad   : > { %s778_s16 = smov 128   ;;  %s779_s20 = smov 8  }
  0xae   : > { %630 = dma.vmem_to_hbm [thread:$0]  (%p839_p10), %s537_s10, 16384, %s539_s29, %s524_s30, %s778_s16, %s778_s16, %s779_s20  }
  0xaf PF: > { %p641_p5 = scmp.ge.s32.totalorder %s774_s9, 2  ;;  %s553_s21 = sand.u32 1, %s762_s6  }
  0xb0   : > { %s554_s22 = scalar_lea.sflag [#allocation4], %s553_s21 }
  0xb1   : > { %p637_p7 = pnand %p641_p5, %p843_p11 }
  0xb3   : > { %p638_p8 = pneg %p637_p7 }
  0xb5   : > { %757 = dma.done.wait (%p638_p8), %s554_s22, 16384  }
  0xb6   : > { %759 = vsyncadd (%p638_p8), %s554_s22, 4294950912  ;;  %p14_p9 = scmp.ge.s32.totalorder %s815_s12, 6   ;;  %s1183_s6 = smov %s766_s7 }
  0xb7   : > { %s1184_s7 = smov %s770_s8  ;;  %s1185_s8 = smov %s827_s15 }
  0xb8   : > { %s1186_s9 = smov %s815_s12  ;;  %16 = sbr.rel (!%p14_p9) target bundleno = 5 (0x5), region = 69 }
  0xbd   :  { %560 = vsyncpa [#allocation3], 1 }
  0xbe   :  { %562 = vsyncpa [#allocation3 + $0x1], 1 }
  0xbf   :  { %563 = vsyncpa [#allocation4], 1 }
  0xc0   :  { %565 = vsyncpa [#allocation4 + $0x1], 1 }

</bundles_post_ra>
